<compile_context>
chip_gen: v7x
topology: tpu7x:2x2x1
jax: 0.10.0
libtpu: 0.0.40
codegen_flags: <defaults>
</compile_context>

<pallas_src>
import functools
import math

import jax
import jax.numpy as jnp
import numpy as np
from jax.experimental import pallas as pl
from jax.experimental.pallas import tpu as pltpu


# ----------------------------------------------------------------------------
# Weight preparation (glue, runs once): fold the EqualLR scale and lower the
# conv weights to banded matmul matrices
#   M[i, p*Cin + c, q*Cout + o] = w_scaled[i, p - q + pad, c, o]   (0 if tap OOB)
# so that  conv(x)[h, q, o] = sum_i  (x_rows[h+i, :] @ M[i])[q*Cout + o].
# Width padding is folded into M; row padding is handled physically.
# ----------------------------------------------------------------------------
def _banded_weight(w_orig, in_w, out_w, pad, dtype):
    cout, cin, kh, kw = w_orig.shape
    scale = np.float32(math.sqrt(2.0 / (cin * kh * kw)))          # EqualLR
    wk = jnp.transpose(w_orig.astype(jnp.float32) * scale, (2, 3, 1, 0))  # (kh,kw,cin,cout)

    p = np.arange(in_w)[:, None]
    q = np.arange(out_w)[None, :]
    j = p - q + pad                                # which tap feeds (p -> q)
    valid = (j >= 0) & (j < kw)
    jc = np.clip(j, 0, kw - 1)

    m = wk[:, jc, :, :]                            # (kh, in_w, out_w, cin, cout)
    m = jnp.where(jnp.asarray(valid)[None, :, :, None, None], m, 0.0)
    m = jnp.transpose(m, (0, 1, 3, 2, 4))          # (kh, in_w, cin, out_w, cout)
    return m.reshape(kh, in_w * cin, out_w * cout).astype(dtype)


# ----------------------------------------------------------------------------
# Fused kernel: conv1 -> bias -> LeakyReLU -> (VMEM scratch) -> conv2 -> bias
# -> LeakyReLU.  One grid step = one batch sample.
# ----------------------------------------------------------------------------
def _make_convblock_kernel(kh1, kh2, h1, h2, pad2, mm_dtype):
    neg = 0.2

    def kernel(x_ref, m1_ref, b1_ref, m2_ref, b2_ref, o_ref, mid_ref):
        # ---- EqualConv2d #1: kh1 banded MXU matmuls, f32 accumulation ----
        acc = jnp.zeros((h1, b1_ref.shape[1]), jnp.float32)
        for i in range(kh1):
            acc = acc + jnp.dot(x_ref[0, i:i + h1, :].astype(mm_dtype),
                                m1_ref[i],
                                preferred_element_type=jnp.float32)
        acc = acc + b1_ref[...]
        act1 = jnp.where(acc > 0, acc, neg * acc)          # LeakyReLU(0.2)

        # Stage the intermediate in VMEM with zero ROW padding for conv2
        # (conv2's width padding is already folded into m2).
        mid_ref[...] = jnp.zeros_like(mid_ref)
        mid_ref[pad2:pad2 + h1, :] = act1

        # ---- EqualConv2d #2: kh2 banded MXU matmuls, f32 accumulation ----
        acc2 = jnp.zeros((h2, b2_ref.shape[1]), jnp.float32)
        for i in range(kh2):
            acc2 = acc2 + jnp.dot(mid_ref[i:i + h2, :].astype(mm_dtype),
                                  m2_ref[i],
                                  preferred_element_type=jnp.float32)
        acc2 = acc2 + b2_ref[...]
        o_ref[0, :, :] = jnp.where(acc2 > 0, acc2, neg * acc2).astype(o_ref.dtype)

    return kernel


# ----------------------------------------------------------------------------
# Wrapper: ConvBlock forward, NCHW in / NCHW out (PyTorch convention).
# ----------------------------------------------------------------------------
def conv_block_forward(x_nchw, params, pad1, pad2, *, use_bf16=True):
    w1_orig, bias1 = params["w1"], params["b1"]
    w2_orig, bias2 = params["w2"], params["b2"]
    cmid, cin, kh1, kw1 = w1_orig.shape
    cout, _, kh2, kw2 = w2_orig.shape
    n, _, h, wd = x_nchw.shape

    mm_dtype = jnp.bfloat16 if use_bf16 else jnp.float32

    # spatial geometry (stride 1)
    hp1 = h + 2 * pad1
    h1 = hp1 - kh1 + 1
    wo1 = wd + 2 * pad1 - kw1 + 1
    hp2 = h1 + 2 * pad2
    h2 = hp2 - kh2 + 1
    wo2 = wo1 + 2 * pad2 - kw2 + 1

    # banded weights (EqualLR scale folded in) + lane-tiled biases
    m1 = _banded_weight(w1_orig, wd, wo1, pad1, mm_dtype)    # (kh1, W*Cin,  Wo1*Cmid)
    m2 = _banded_weight(w2_orig, wo1, wo2, pad2, mm_dtype)   # (kh2, Wo1*Cmid, Wo2*Cout)
    b1t = jnp.tile(bias1, wo1).reshape(1, wo1 * cmid).astype(jnp.float32)
    b2t = jnp.tile(bias2, wo2).reshape(1, wo2 * cout).astype(jnp.float32)

    # NCHW -> NHWC once at the boundary, pad rows only (col pad lives in m1),
    # flatten (W, Cin) into a single lane axis.
    x = jnp.transpose(x_nchw, (0, 2, 3, 1))
    x = jnp.pad(x, ((0, 0), (pad1, pad1), (0, 0), (0, 0)))
    x = x.reshape(n, hp1, wd * cin).astype(jnp.float32)

    kernel = _make_convblock_kernel(kh1, kh2, h1, h2, pad2, mm_dtype)

    out = pl.pallas_call(
        kernel,
        out_shape=jax.ShapeDtypeStruct((n, h2, wo2 * cout), jnp.float32),
        grid=(n,),
        in_specs=[
            pl.BlockSpec((1, hp1, wd * cin), lambda i: (i, 0, 0)),            # streamed
            pl.BlockSpec((kh1, wd * cin, wo1 * cmid), lambda i: (0, 0, 0)),   # resident
            pl.BlockSpec((1, wo1 * cmid), lambda i: (0, 0)),                  # resident
            pl.BlockSpec((kh2, wo1 * cmid, wo2 * cout), lambda i: (0, 0, 0)),  # resident
            pl.BlockSpec((1, wo2 * cout), lambda i: (0, 0)),                  # resident
        ],
        out_specs=pl.BlockSpec((1, h2, wo2 * cout), lambda i: (i, 0, 0)),     # lane-dense
        scratch_shapes=[pltpu.VMEM((hp2, wo1 * cmid), jnp.float32)],
        compiler_params=pltpu.CompilerParams(
            dimension_semantics=("parallel",),          # megacore sharding on v7x
            vmem_limit_bytes=32 * 1024 * 1024),         # explicit (v7x: 64 MiB phys)
    )(x, m1, b1t, m2, b2t)

    out = out.reshape(n, h2, wo2, cout)
    return jnp.transpose(out, (0, 3, 1, 2))             # NHWC -> NCHW


# ----------------------------------------------------------------------------
# Pure-JAX reference (correctness check only). With mm_dtype=bfloat16 the
# matmul operands are rounded exactly like the kernel's bf16 fast path
# (accumulation stays f32), so the comparison can stay tight.
# ----------------------------------------------------------------------------
def _ref_forward(x_nchw, params, pad1, pad2, mm_dtype=jnp.float32):
    def eq_conv(x, w_orig, b, pad):
        cout, cin, kh, kw = w_orig.shape
        wsc = w_orig * np.float32(math.sqrt(2.0 / (cin * kh * kw)))
        y = jax.lax.conv_general_dilated(
            x.astype(mm_dtype), wsc.astype(mm_dtype),
            window_strides=(1, 1), padding=[(pad, pad), (pad, pad)],
            dimension_numbers=("NCHW", "OIHW", "NCHW"),
            preferred_element_type=jnp.float32)
        y = y + b.reshape(1, cout, 1, 1)
        return jnp.where(y > 0, y, 0.2 * y)

    x = eq_conv(x_nchw, params["w1"], params["b1"], pad1)
    x = eq_conv(x, params["w2"], params["b2"], pad2)
    return x


if __name__ == "__main__":
    # ConvBlock(in_channel=4, out_channel=8, kernel_size=3, padding=1)
    in_channel, out_channel = 4, 8
    ksize = 3
    pad1 = pad2 = 1
    batch, spatial = 2, 16

    key = jax.random.PRNGKey(0)
    k_x, k_w1, k_w2 = jax.random.split(key, 3)

    # conv.weight.data.normal_(), conv.bias.data.zero_()  (weight_orig)
    params = {
        "w1": jax.random.normal(
            k_w1, (out_channel, in_channel, ksize, ksize), jnp.float32),
        "b1": jnp.zeros((out_channel,), jnp.float32),
        "w2": jax.random.normal(
            k_w2, (out_channel, out_channel, ksize, ksize), jnp.float32),
        "b2": jnp.zeros((out_channel,), jnp.float32),
    }
    x = jax.random.normal(k_x, (batch, in_channel, spatial, spatial),
                          jnp.float32)

    # 1) exact-precision path (f32 matmuls) vs. the f32 module reference.
    fwd_f32 = jax.jit(functools.partial(
        conv_block_forward, pad1=pad1, pad2=pad2, use_bf16=False))
    out_f32 = jax.block_until_ready(fwd_f32(x, params))
    ref_f32 = jax.block_until_ready(_ref_forward(x, params, pad1, pad2))
    assert out_f32.shape == (batch, out_channel, spatial, spatial), out_f32.shape
    np.testing.assert_allclose(np.asarray(out_f32), np.asarray(ref_f32),
                               rtol=1e-4, atol=1e-4)

    # 2) fast path (bf16 matmul operands, f32 accumulate/epilogue) vs. a
    #    reference with identical operand rounding.
    fwd_bf16 = jax.jit(functools.partial(
        conv_block_forward, pad1=pad1, pad2=pad2, use_bf16=True))
    out_bf16 = jax.block_until_ready(fwd_bf16(x, params))
    ref_bf16 = jax.block_until_ready(
        _ref_forward(x, params, pad1, pad2, mm_dtype=jnp.bfloat16))
    np.testing.assert_allclose(np.asarray(out_bf16), np.asarray(ref_bf16),
                               rtol=5e-3, atol=5e-3)

    print("KERNEL_OK")
</pallas_src>

<mosaic_0001>
module attributes {stable_mosaic.version = 11 : i64} {
  func.func @kernel(%arg0: i32, %arg1: memref<1x18x64xf32, #tpu.memory_space<vmem>>, %arg2: memref<3x64x128xf32, #tpu.memory_space<vmem>>, %arg3: memref<1x128xf32, #tpu.memory_space<vmem>>, %arg4: memref<3x128x128xf32, #tpu.memory_space<vmem>>, %arg5: memref<1x128xf32, #tpu.memory_space<vmem>>, %arg6: memref<1x16x128xf32, #tpu.memory_space<vmem>>, %arg7: memref<18x128xf32, #tpu.memory_space<vmem>>) attributes {dimension_semantics = [#tpu.dimension_semantics<parallel>], iteration_bounds = array<i64: 2>, scalar_prefetch = 0 : i64, scratch_operands = 1 : i64, tpu.core_type = #tpu.core_type<tc>, window_params = [{transform_indices = @transform_0, window_bounds = array<i64: 1, 18, 64>}, {pipeline_mode = #tpu.pipeline_mode<synchronous>, transform_indices = @transform_1, window_bounds = array<i64: 3, 64, 128>}, {pipeline_mode = #tpu.pipeline_mode<synchronous>, transform_indices = @transform_2, window_bounds = array<i64: 1, 128>}, {pipeline_mode = #tpu.pipeline_mode<synchronous>, transform_indices = @transform_3, window_bounds = array<i64: 3, 128, 128>}, {pipeline_mode = #tpu.pipeline_mode<synchronous>, transform_indices = @transform_4, window_bounds = array<i64: 1, 128>}, {transform_indices = @transform_5, window_bounds = array<i64: 1, 16, 128>}]} {
    %cst = arith.constant 0.000000e+00 : f32
    %0 = vector.broadcast %cst : f32 to vector<16x128xf32>
    %c0 = arith.constant 0 : index
    %c0_0 = arith.constant 0 : index
    %c0_1 = arith.constant 0 : index
    %1 = vector.load %arg1[%c0, %c0_0, %c0_1] : memref<1x18x64xf32, #tpu.memory_space<vmem>>, vector<1x16x64xf32>
    %2 = vector.shape_cast %1 : vector<1x16x64xf32> to vector<16x64xf32>
    %c0_2 = arith.constant 0 : index
    %c0_3 = arith.constant 0 : index
    %c0_4 = arith.constant 0 : index
    %3 = vector.load %arg2[%c0_2, %c0_3, %c0_4] : memref<3x64x128xf32, #tpu.memory_space<vmem>>, vector<1x64x128xf32>
    %4 = vector.shape_cast %3 : vector<1x64x128xf32> to vector<64x128xf32>
    %cst_5 = arith.constant dense<0.000000e+00> : vector<16x128xf32>
    %5 = tpu.matmul %2, %4, %cst_5 {dimension_numbers = #tpu.dot_dimension_numbers<[1], [0], [0], [1], [0, 0, 1, 1], [], []>} : vector<16x64xf32>, vector<64x128xf32>, vector<16x128xf32> -> vector<16x128xf32>
    %6 = arith.addf %0, %5 : vector<16x128xf32>
    %c0_6 = arith.constant 0 : index
    %c1 = arith.constant 1 : index
    %c0_7 = arith.constant 0 : index
    %7 = vector.load %arg1[%c0_6, %c1, %c0_7] : memref<1x18x64xf32, #tpu.memory_space<vmem>>, vector<1x16x64xf32>
    %8 = vector.shape_cast %7 : vector<1x16x64xf32> to vector<16x64xf32>
    %c1_8 = arith.constant 1 : index
    %c0_9 = arith.constant 0 : index
    %c0_10 = arith.constant 0 : index
    %9 = vector.load %arg2[%c1_8, %c0_9, %c0_10] : memref<3x64x128xf32, #tpu.memory_space<vmem>>, vector<1x64x128xf32>
    %10 = vector.shape_cast %9 : vector<1x64x128xf32> to vector<64x128xf32>
    %cst_11 = arith.constant dense<0.000000e+00> : vector<16x128xf32>
    %11 = tpu.matmul %8, %10, %cst_11 {dimension_numbers = #tpu.dot_dimension_numbers<[1], [0], [0], [1], [0, 0, 1, 1], [], []>} : vector<16x64xf32>, vector<64x128xf32>, vector<16x128xf32> -> vector<16x128xf32>
    %12 = arith.addf %6, %11 : vector<16x128xf32>
    %c0_12 = arith.constant 0 : index
    %c2 = arith.constant 2 : index
    %c0_13 = arith.constant 0 : index
    %13 = vector.load %arg1[%c0_12, %c2, %c0_13] : memref<1x18x64xf32, #tpu.memory_space<vmem>>, vector<1x16x64xf32>
    %14 = vector.shape_cast %13 : vector<1x16x64xf32> to vector<16x64xf32>
    %c2_14 = arith.constant 2 : index
    %c0_15 = arith.constant 0 : index
    %c0_16 = arith.constant 0 : index
    %15 = vector.load %arg2[%c2_14, %c0_15, %c0_16] : memref<3x64x128xf32, #tpu.memory_space<vmem>>, vector<1x64x128xf32>
    %16 = vector.shape_cast %15 : vector<1x64x128xf32> to vector<64x128xf32>
    %cst_17 = arith.constant dense<0.000000e+00> : vector<16x128xf32>
    %17 = tpu.matmul %14, %16, %cst_17 {dimension_numbers = #tpu.dot_dimension_numbers<[1], [0], [0], [1], [0, 0, 1, 1], [], []>} : vector<16x64xf32>, vector<64x128xf32>, vector<16x128xf32> -> vector<16x128xf32>
    %18 = arith.addf %12, %17 : vector<16x128xf32>
    %c0_18 = arith.constant 0 : index
    %c0_19 = arith.constant 0 : index
    %19 = vector.load %arg3[%c0_18, %c0_19] : memref<1x128xf32, #tpu.memory_space<vmem>>, vector<1x128xf32>
    %20 = vector.broadcast %19 : vector<1x128xf32> to vector<16x128xf32>
    %21 = arith.addf %18, %20 : vector<16x128xf32>
    %cst_20 = arith.constant 0.000000e+00 : f32
    %22 = vector.broadcast %cst_20 : f32 to vector<16x128xf32>
    %23 = arith.cmpf ogt, %21, %22 : vector<16x128xf32>
    %cst_21 = arith.constant 2.000000e-01 : f32
    %24 = vector.broadcast %cst_21 : f32 to vector<16x128xf32>
    %25 = arith.mulf %24, %21 : vector<16x128xf32>
    %26 = arith.select %23, %21, %25 : vector<16x128xi1>, vector<16x128xf32>
    %cst_22 = arith.constant 0.000000e+00 : f32
    %27 = vector.broadcast %cst_22 : f32 to vector<18x128xf32>
    %c0_23 = arith.constant 0 : index
    %c0_24 = arith.constant 0 : index
    %28 = vector.load %arg7[%c0_23, %c0_24] : memref<18x128xf32, #tpu.memory_space<vmem>>, vector<18x128xf32>
    tpu.vector_store %arg7[%c0_23, %c0_24], %27 {strides = array<i32>} : memref<18x128xf32, #tpu.memory_space<vmem>>, vector<18x128xf32>,
    %c1_25 = arith.constant 1 : index
    %c0_26 = arith.constant 0 : index
    %29 = vector.load %arg7[%c1_25, %c0_26] : memref<18x128xf32, #tpu.memory_space<vmem>>, vector<16x128xf32>
    tpu.vector_store %arg7[%c1_25, %c0_26], %26 {strides = array<i32>} : memref<18x128xf32, #tpu.memory_space<vmem>>, vector<16x128xf32>,
    %cst_27 = arith.constant 0.000000e+00 : f32
    %30 = vector.broadcast %cst_27 : f32 to vector<16x128xf32>
    %c0_28 = arith.constant 0 : index
    %c0_29 = arith.constant 0 : index
    %31 = vector.load %arg7[%c0_28, %c0_29] : memref<18x128xf32, #tpu.memory_space<vmem>>, vector<16x128xf32>
    %c0_30 = arith.constant 0 : index
    %c0_31 = arith.constant 0 : index
    %c0_32 = arith.constant 0 : index
    %32 = vector.load %arg4[%c0_30, %c0_31, %c0_32] : memref<3x128x128xf32, #tpu.memory_space<vmem>>, vector<1x128x128xf32>
    %33 = vector.shape_cast %32 : vector<1x128x128xf32> to vector<128x128xf32>
    %cst_33 = arith.constant dense<0.000000e+00> : vector<16x128xf32>
    %34 = tpu.matmul %31, %33, %cst_33 {dimension_numbers = #tpu.dot_dimension_numbers<[1], [0], [0], [1], [0, 0, 1, 1], [], []>} : vector<16x128xf32>, vector<128x128xf32>, vector<16x128xf32> -> vector<16x128xf32>
    %35 = arith.addf %30, %34 : vector<16x128xf32>
    %c1_34 = arith.constant 1 : index
    %c0_35 = arith.constant 0 : index
    %36 = vector.load %arg7[%c1_34, %c0_35] : memref<18x128xf32, #tpu.memory_space<vmem>>, vector<16x128xf32>
    %c1_36 = arith.constant 1 : index
    %c0_37 = arith.constant 0 : index
    %c0_38 = arith.constant 0 : index
    %37 = vector.load %arg4[%c1_36, %c0_37, %c0_38] : memref<3x128x128xf32, #tpu.memory_space<vmem>>, vector<1x128x128xf32>
    %38 = vector.shape_cast %37 : vector<1x128x128xf32> to vector<128x128xf32>
    %cst_39 = arith.constant dense<0.000000e+00> : vector<16x128xf32>
    %39 = tpu.matmul %36, %38, %cst_39 {dimension_numbers = #tpu.dot_dimension_numbers<[1], [0], [0], [1], [0, 0, 1, 1], [], []>} : vector<16x128xf32>, vector<128x128xf32>, vector<16x128xf32> -> vector<16x128xf32>
    %40 = arith.addf %35, %39 : vector<16x128xf32>
    %c2_40 = arith.constant 2 : index
    %c0_41 = arith.constant 0 : index
    %41 = vector.load %arg7[%c2_40, %c0_41] : memref<18x128xf32, #tpu.memory_space<vmem>>, vector<16x128xf32>
    %c2_42 = arith.constant 2 : index
    %c0_43 = arith.constant 0 : index
    %c0_44 = arith.constant 0 : index
    %42 = vector.load %arg4[%c2_42, %c0_43, %c0_44] : memref<3x128x128xf32, #tpu.memory_space<vmem>>, vector<1x128x128xf32>
    %43 = vector.shape_cast %42 : vector<1x128x128xf32> to vector<128x128xf32>
    %cst_45 = arith.constant dense<0.000000e+00> : vector<16x128xf32>
    %44 = tpu.matmul %41, %43, %cst_45 {dimension_numbers = #tpu.dot_dimension_numbers<[1], [0], [0], [1], [0, 0, 1, 1], [], []>} : vector<16x128xf32>, vector<128x128xf32>, vector<16x128xf32> -> vector<16x128xf32>
    %45 = arith.addf %40, %44 : vector<16x128xf32>
    %c0_46 = arith.constant 0 : index
    %c0_47 = arith.constant 0 : index
    %46 = vector.load %arg5[%c0_46, %c0_47] : memref<1x128xf32, #tpu.memory_space<vmem>>, vector<1x128xf32>
    %47 = vector.broadcast %46 : vector<1x128xf32> to vector<16x128xf32>
    %48 = arith.addf %45, %47 : vector<16x128xf32>
    %cst_48 = arith.constant 0.000000e+00 : f32
    %49 = vector.broadcast %cst_48 : f32 to vector<16x128xf32>
    %50 = arith.cmpf ogt, %48, %49 : vector<16x128xf32>
    %cst_49 = arith.constant 2.000000e-01 : f32
    %51 = vector.broadcast %cst_49 : f32 to vector<16x128xf32>
    %52 = arith.mulf %51, %48 : vector<16x128xf32>
    %53 = arith.select %50, %48, %52 : vector<16x128xi1>, vector<16x128xf32>
    %c0_50 = arith.constant 0 : index
    %c0_51 = arith.constant 0 : index
    %c0_52 = arith.constant 0 : index
    %54 = vector.load %arg6[%c0_50, %c0_51, %c0_52] : memref<1x16x128xf32, #tpu.memory_space<vmem>>, vector<1x16x128xf32>
    %55 = vector.shape_cast %54 : vector<1x16x128xf32> to vector<16x128xf32>
    %56 = vector.shape_cast %53 : vector<16x128xf32> to vector<1x16x128xf32>
    tpu.vector_store %arg6[%c0_50, %c0_51, %c0_52], %56 {strides = array<i32>} : memref<1x16x128xf32, #tpu.memory_space<vmem>>, vector<1x16x128xf32>,
    return
  }
  func.func @transform_0(%arg0: i32) -> (i32, i32, i32) {
    %c0_i32 = arith.constant 0 : i32
    %c0_i32_0 = arith.constant 0 : i32
    %c0_i32_1 = arith.constant 0 : i32
    return %arg0, %c0_i32, %c0_i32_0 : i32, i32, i32
  }
  func.func @transform_1(%arg0: i32) -> (i32, i32, i32) {
    %c0_i32 = arith.constant 0 : i32
    %c0_i32_0 = arith.constant 0 : i32
    %c0_i32_1 = arith.constant 0 : i32
    %c0_i32_2 = arith.constant 0 : i32
    return %c0_i32, %c0_i32_0, %c0_i32_1 : i32, i32, i32
  }
  func.func @transform_2(%arg0: i32) -> (i32, i32) {
    %c0_i32 = arith.constant 0 : i32
    %c0_i32_0 = arith.constant 0 : i32
    %c0_i32_1 = arith.constant 0 : i32
    return %c0_i32, %c0_i32_0 : i32, i32
  }
  func.func @transform_3(%arg0: i32) -> (i32, i32, i32) {
    %c0_i32 = arith.constant 0 : i32
    %c0_i32_0 = arith.constant 0 : i32
    %c0_i32_1 = arith.constant 0 : i32
    %c0_i32_2 = arith.constant 0 : i32
    return %c0_i32, %c0_i32_0, %c0_i32_1 : i32, i32, i32
  }
  func.func @transform_4(%arg0: i32) -> (i32, i32) {
    %c0_i32 = arith.constant 0 : i32
    %c0_i32_0 = arith.constant 0 : i32
    %c0_i32_1 = arith.constant 0 : i32
    return %c0_i32, %c0_i32_0 : i32, i32
  }
  func.func @transform_5(%arg0: i32) -> (i32, i32, i32) {
    %c0_i32 = arith.constant 0 : i32
    %c0_i32_0 = arith.constant 0 : i32
    %c0_i32_1 = arith.constant 0 : i32
    return %arg0, %c0_i32, %c0_i32_0 : i32, i32, i32
  }
}

</mosaic_0001>

<bundles_post_ra>
// kernel: tile.13
= control target key start
LH: loop header
LB: loop body
LE: loop exit
PB: predicated region body
PF: predicated region fallthrough
CT: control target
= control target key end

     0   :  { %s28_s0 = inlined_call_operand.vmem [shape: f32[8], index: 0, kind: input, shape index: {}]   ;;  %s29_s1 = inlined_call_operand.vmem [shape: f32[16,8], index: 1, kind: output, shape index: {}]  }
   0x1   :  { %v4_v0 = vld [vmem:[%s28_s0] ss:$0 sm:$0xff] }
   0x2   :  { %5 = vst [vmem:[%s29_s1] sm:$0xff] %v4_v0  ;;  %8 = vst [vmem:[%s29_s1 + $0x8] sm:$0xff] %v4_v0 }

// kernel: tile.14
= control target key start
LH: loop header
LB: loop body
LE: loop exit
PB: predicated region body
PF: predicated region fallthrough
CT: control target
= control target key end

     0   :  { %s131_s10 = smov 120   ;;  %s132_s11 = smov 104   ;;  %vm3_vm0 = vcmask 64512   ;;  %vm9_vm1 = vcmask 1048512   ;;  %vm15_vm2 = vcmask 982912   ;;  %vm21_vm3 = vcmask 917312   ;;  %s207_s0 = inlined_call_operand.vmem [shape: f32[16,8], index: 0, kind: input, shape index: {}]   ;;  %s208_s1 = inlined_call_operand.vmem [shape: f32[1,128], index: 1, kind: output, shape index: {}]  }
   0x1   :  { %v101_v0 = vld [vmem:[%s207_s0 + $0xf] sm:$0x1]   ;;  %v103_v1 = vld [vmem:[%s207_s0 + $0xd] sm:$0x1]   ;;  %v102_v2 = vld [vmem:[%s207_s0 + $0xe] sm:$0x1]  }
   0x2   :  { %7 = vrot.lane.b32.xlu0 %v101_v0, %s131_s10  ;;  %19 = vrot.lane.b32.xlu1 %v103_v1, %s132_s11  ;;  %v104_v3 = vld [vmem:[%s207_s0 + $0xc] sm:$0x1]   ;;  %s133_s16 = smov 112   ;;  %s134_s17 = smov 96   ;;  %v105_v4 = vld [vmem:[%s207_s0 + $0xb] sm:$0x1]  }
   0x3   :  { %v106_v5 = vld [vmem:[%s207_s0 + $0xa] sm:$0x1]   ;;  %v2_v6 = vld [vmem:[%s207_s0] sm:$0x1]   ;;  %s135_s24 = smov 88   ;;  %s136_s25 = smov 80  }
   0x4   :  { %4 = vst.msk [vmem:[#allocation0] sm:$0x1] %vm3_vm0, %v2_v6   ;;  %v107_v7 = vld [vmem:[%s207_s0 + $0x9] sm:$0x1]   ;;  %v108_v8 = vld [vmem:[%s207_s0 + $0x8] sm:$0x1]  }
   0x5   :  { %s137_s30 = smov 72   ;;  %s138_s2 = smov 64   ;;  %v109_v9 = vld [vmem:[%s207_s0 + $0x7] sm:$0x1]   ;;  %v110_v10 = vld [vmem:[%s207_s0 + $0x6] sm:$0x1]  }
   0x6   :  { %13 = vrot.lane.b32.xlu0 %v102_v2, %s133_s16  ;;  %25 = vrot.lane.b32.xlu1 %v104_v3, %s134_s17  ;;  %s139_s7 = smov 56   ;;  %s140_s8 = smov 48   ;;  %v111_v11 = vld [vmem:[%s207_s0 + $0x5] sm:$0x1]   ;;  %v112_v12 = vld [vmem:[%s207_s0 + $0x4] sm:$0x1]  }
   0x7   :  { %s141_s13 = smov 40   ;;  %s142_s14 = smov 32   ;;  %v113_v13 = vld [vmem:[%s207_s0 + $0x3] sm:$0x1]   ;;  %v114_v14 = vld [vmem:[%s207_s0 + $0x2] sm:$0x1]  }
   0x8   :  { %s143_s19 = smov 24   ;;  %s144_s20 = smov 16   ;;  %v115_v15 = vld [vmem:[%s207_s0 + $0x1] sm:$0x1]   ;;  %vm27_vm4 = vcmask 851712   ;;  %vm33_vm5 = vcmask 786112  }
   0x9   :  { %s145_s0 = smov 8   ;;  %vm39_vm6 = vcmask 720512   ;;  %vm45_vm7 = vcmask 654912   ;;  %vm51_vm8 = vcmask 589312   ;;  %vm57_vm9 = vcmask 523712  }
   0xa   :  { %31 = vrot.lane.b32.xlu0 %v105_v4, %s135_s24  ;;  %37 = vrot.lane.b32.xlu1 %v106_v5, %s136_s25  ;;  %vm63_vm10 = vcmask 458112   ;;  %vm69_vm11 = vcmask 392512   ;;  %vm75_vm12 = vcmask 326912   ;;  %vm81_vm13 = vcmask 261312  }
   0xb   :  { %vm87_vm14 = vcmask 195712   ;;  %vm93_vm15 = vcmask 130112  }
   0xe   :  { %43 = vrot.lane.b32.xlu0 %v107_v7, %s137_s30  ;;  %49 = vrot.lane.b32.xlu1 %v108_v8, %s138_s2 }
  0x12   :  { %55 = vrot.lane.b32.xlu0 %v109_v9, %s139_s7  ;;  %61 = vrot.lane.b32.xlu1 %v110_v10, %s140_s8 }
  0x16   :  { %67 = vrot.lane.b32.xlu0 %v111_v11, %s141_s13  ;;  %73 = vrot.lane.b32.xlu1 %v112_v12, %s142_s14 }
  0x1a   :  { %79 = vrot.lane.b32.xlu0 %v113_v13, %s143_s19  ;;  %85 = vrot.lane.b32.xlu1 %v114_v14, %s144_s20 }
  0x1e   :  { %91 = vrot.lane.b32.xlu0 %v115_v15, %s145_s0 }
  0x74   :  { %v8_v16 = vpop.permute.xlu0 %7   ;;  %v20_v17 = vpop.permute.xlu1 %19  }
  0x75   :  { %10 = vst.msk [vmem:[#allocation0] sm:$0x1] %vm9_vm1, %v8_v16  }
  0x78   :  { %v14_v18 = vpop.permute.xlu0 %13   ;;  %v26_v19 = vpop.permute.xlu1 %25  }
  0x79   :  { %16 = vst.msk [vmem:[#allocation0] sm:$0x1] %vm15_vm2, %v14_v18  }
  0x7a   :  { %22 = vst.msk [vmem:[#allocation0] sm:$0x1] %vm21_vm3, %v20_v17  }
  0x7b   :  { %28 = vst.msk [vmem:[#allocation0] sm:$0x1] %vm27_vm4, %v26_v19  }
  0x7c   :  { %v32_v20 = vpop.permute.xlu0 %31   ;;  %v38_v21 = vpop.permute.xlu1 %37  }
  0x7d   :  { %34 = vst.msk [vmem:[#allocation0] sm:$0x1] %vm33_vm5, %v32_v20  }
  0x7e   :  { %40 = vst.msk [vmem:[#allocation0] sm:$0x1] %vm39_vm6, %v38_v21  }
  0x80   :  { %v44_v22 = vpop.permute.xlu0 %43   ;;  %v50_v23 = vpop.permute.xlu1 %49  }
  0x81   :  { %46 = vst.msk [vmem:[#allocation0] sm:$0x1] %vm45_vm7, %v44_v22  }
  0x82   :  { %52 = vst.msk [vmem:[#allocation0] sm:$0x1] %vm51_vm8, %v50_v23  }
  0x84   :  { %v56_v24 = vpop.permute.xlu0 %55   ;;  %v62_v25 = vpop.permute.xlu1 %61  }
  0x85   :  { %58 = vst.msk [vmem:[#allocation0] sm:$0x1] %vm57_vm9, %v56_v24  }
  0x86   :  { %64 = vst.msk [vmem:[#allocation0] sm:$0x1] %vm63_vm10, %v62_v25  }
  0x88   :  { %v68_v26 = vpop.permute.xlu0 %67   ;;  %v74_v27 = vpop.permute.xlu1 %73  }
  0x89   :  { %70 = vst.msk [vmem:[#allocation0] sm:$0x1] %vm69_vm11, %v68_v26  }
  0x8a   :  { %76 = vst.msk [vmem:[#allocation0] sm:$0x1] %vm75_vm12, %v74_v27  }
  0x8c   :  { %v80_v28 = vpop.permute.xlu0 %79   ;;  %v86_v29 = vpop.permute.xlu1 %85  }
  0x8d   :  { %82 = vst.msk [vmem:[#allocation0] sm:$0x1] %vm81_vm13, %v80_v28  }
  0x8e   :  { %88 = vst.msk [vmem:[#allocation0] sm:$0x1] %vm87_vm14, %v86_v29  }
  0x90   :  { %v92_v30 = vpop.permute.xlu0 %91  }
  0x91   :  { %94 = vst.msk [vmem:[#allocation0] sm:$0x1] %vm93_vm15, %v92_v30  }
  0x98   :  { %v98_v31 = vld [vmem:[#allocation0] sm:$0x1] }
  0x99   :  { %100 = vst [vmem:[%s208_s1] sm:$0x1] %v98_v31 }

// kernel: conv_block_forward.1
= control target key start
LH: loop header
LB: loop body
LE: loop exit
PB: predicated region body
PF: predicated region fallthrough
CT: control target
= control target key end

     0   :  { %s1392_s18 = smov 0   ;;  %s1649_s0 = inlined_call_operand.vmem [shape: f32[2,18,64], index: 0, kind: input, shape index: {}]   ;;  %s1650_s1 = inlined_call_operand.vmem [shape: f32[3,64,128], index: 1, kind: input, shape index: {}]   ;;  %s1651_s2 = inlined_call_operand.vmem [shape: f32[1,128], index: 2, kind: input, shape index: {}]   ;;  %s1652_s3 = inlined_call_operand.vmem [shape: f32[3,128,128], index: 3, kind: input, shape index: {}]   ;;  %s1653_s4 = inlined_call_operand.vmem [shape: f32[1,128], index: 4, kind: input, shape index: {}]   ;;  %s1654_s5 = inlined_call_operand.vmem [shape: f32[2,16,128], index: 5, kind: output, shape index: {}]  }
   0x1 LB: > { %s878_s19 = sadd.s32 4294967295, %s1359_s18   ;;  %p882_p0 = scmp.ge.s32.totalorder %s1359_s18, 1  ;;  %s1359_s18 = sphi %s1392_s18, %s15_s18  }
   0x2   : > { %p187_p1 = scmp.lt.s32.totalorder %s1359_s18, 3 }
   0x4   : > { %p188_p2 = pnand %p882_p0, %p187_p1 }
   0x5   : > { %v886_v0 = vld [vmem:[%s1650_s1 + $0x40] sm:$0xff] (!%p188_p2)  ;;  %v887_v1 = vld [vmem:[%s1650_s1 + $0x48] sm:$0xff] (!%p188_p2)  ;;  %v888_v2 = vld [vmem:[%s1650_s1 + $0x50] sm:$0xff] (!%p188_p2)  ;;  %p215_p3 = scmp.lt.s32.totalorder (!%p188_p2), %s878_s19, 1  ;;  %vm246_vm0 = vcmask (!%p188_p2), 523264  }
   0x6   : > { %191 = sbr.rel (%p188_p2) target bundleno = 536 (0x218), region = 40  ;;  %v1191_v3 = vpack.c.bf16 (!%p188_p2), %v887_v1, %v886_v0  ;;  %v889_v4 = vld [vmem:[%s1650_s1 + $0x58] sm:$0xff] (!%p188_p2)  ;;  %v890_v6 = vld [vmem:[%s1650_s1 + $0x60] sm:$0xff] (!%p188_p2)  ;;  %v891_v7 = vld [vmem:[%s1650_s1 + $0x68] sm:$0xff] (!%p188_p2) }
   0x7   : > { %v1195_v5 = vpack.c.bf16 (!%p188_p2), %v889_v4, %v888_v2  ;;  %v1199_v8 = vpack.c.bf16 (!%p188_p2), %v891_v7, %v890_v6  ;;  %v892_v9 = vld [vmem:[%s1650_s1 + $0x70] sm:$0xff] (!%p188_p2)  ;;  %v893_v10 = vld [vmem:[%s1650_s1 + $0x78] sm:$0xff] (!%p188_p2)  ;;  %v227_v13 = vld [vmem:[%s1650_s1] sm:$0xff] (!%p188_p2) }
   0x8   : > { %1192 = vmatprep.subr.bf16.mxu0 (!%p188_p2), %v1191_v3  ;;  %v1203_v12 = vpack.c.bf16 (!%p188_p2), %v893_v10, %v892_v9  ;;  %v228_v14 = vld [vmem:[%s1650_s1 + $0x8] sm:$0xff] (!%p188_p2)  ;;  %v525_v15 = vld [vmem:[%s1652_s3] sm:$0xff] (!%p188_p2)  ;;  %v527_v18 = vld [vmem:[%s1652_s3 + $0x10] sm:$0xff] (!%p188_p2) }
   0x9   : > { %1194 = vmatpush3.bf16.msra.mxu0 (!%p188_p2), %v1191_v3  ;;  %v526_v16 = vld [vmem:[%s1652_s3 + $0x8] sm:$0xff] (!%p188_p2)  ;;  %v528_v19 = vld [vmem:[%s1652_s3 + $0x18] sm:$0xff] (!%p188_p2)  ;;  %v529_v21 = vld [vmem:[%s1652_s3 + $0x20] sm:$0xff] (!%p188_p2)  ;;  %v1207_v22 = vpack.c.bf16 (!%p188_p2), %v228_v14, %v227_v13 }
   0xa   : > { %1196 = vmatprep.subr.bf16.mxu0 (!%p188_p2), %v1195_v5  ;;  %v1271_v17 = vpack.c.bf16 (!%p188_p2), %v526_v16, %v525_v15  ;;  %v1275_v20 = vpack.c.bf16 (!%p188_p2), %v528_v19, %v527_v18  ;;  %v530_v23 = vld [vmem:[%s1652_s3 + $0x28] sm:$0xff] (!%p188_p2)  ;;  %v229_v24 = vld [vmem:[%s1650_s1 + $0x10] sm:$0xff] (!%p188_p2)  ;;  %v230_v25 = vld [vmem:[%s1650_s1 + $0x18] sm:$0xff] (!%p188_p2) }
   0xb   : > { %v1279_v26 = vpack.c.bf16 (!%p188_p2), %v530_v23, %v529_v21  ;;  %v531_v28 = vld [vmem:[%s1652_s3 + $0x30] sm:$0xff] (!%p188_p2)  ;;  %v532_v29 = vld [vmem:[%s1652_s3 + $0x38] sm:$0xff] (!%p188_p2)  ;;  %v1211_v30 = vpack.c.bf16 (!%p188_p2), %v230_v25, %v229_v24  ;;  %v231_v32 = vld [vmem:[%s1650_s1 + $0x20] sm:$0xff] (!%p188_p2) }
   0xc   : > { %1272 = vmatprep.subr.bf16.mxu1 (!%p188_p2), %v1271_v17  ;;  %v232_v33 = vld [vmem:[%s1650_s1 + $0x28] sm:$0xff] (!%p188_p2)  ;;  %v1283_v34 = vpack.c.bf16 (!%p188_p2), %v532_v29, %v531_v28  ;;  %v533_v35 = vld [vmem:[%s1652_s3 + $0x40] sm:$0xff] (!%p188_p2)  ;;  %v233_v38 = vld [vmem:[%s1650_s1 + $0x30] sm:$0xff] (!%p188_p2) }
   0xd   : > { %s1656_s19 = smov (!%p215_p3, %s878_s19), 1  ;;  %1198 = vmatpush3.bf16.msra.mxu0 %v1195_v5  ;;  %1274 = vmatpush3.bf16.msra.mxu1 %v1271_v17  ;;  %v534_v36 = vld [vmem:[%s1652_s3 + $0x48] sm:$0xff]  ;;  %v1215_v37 = vpack.c.bf16 %v232_v33, %v231_v32  ;;  %v234_v39 = vld [vmem:[%s1650_s1 + $0x38] sm:$0xff]  ;;  %v898_v42 = vld [vmem:[%s1650_s1 + $0x80] sm:$0xff] }
   0xe   : > { %s1343_s7 = smul.u32 24, %s1656_s19  ;;  %1200 = vmatprep.subr.bf16.mxu0 %v1199_v8  ;;  %1276 = vmatprep.subr.bf16.mxu1 %v1275_v20  ;;  %v1287_v40 = vpack.c.bf16 %v534_v36, %v533_v35  ;;  %v1219_v41 = vpack.c.bf16 %v234_v39, %v233_v38  ;;  %v899_v43 = vld [vmem:[%s1650_s1 + $0x88] sm:$0xff]  ;;  %v900_v45 = vld [vmem:[%s1650_s1 + $0x90] sm:$0xff]  ;;  %v901_v46 = vld [vmem:[%s1650_s1 + $0x98] sm:$0xff]  ;;  %s944_s11 = sshll.u32 %s1656_s19, 4 }
   0xf   : > { %v1223_v44 = vpack.c.bf16 %v899_v43, %v898_v42  ;;  %v1227_v48 = vpack.c.bf16 %v901_v46, %v900_v45  ;;  %v902_v50 = vld [vmem:[%s1650_s1 + $0xa0] sm:$0xff]  ;;  %v903_v51 = vld [vmem:[%s1650_s1 + $0xa8] sm:$0xff]  ;;  %v904_v53 = vld [vmem:[%s1650_s1 + $0xb0] sm:$0xff] }
  0x10   : > { %s1430_s14 = scalar_lea.vmem %s1649_s0, %s1343_s7  ;;  %v1231_v52 = vpack.c.bf16 %v903_v51, %v902_v50  ;;  %v905_v54 = vld [vmem:[%s1650_s1 + $0xb8] sm:$0xff]  ;;  %v909_v56 = vld [vmem:[%s1652_s3 + $0x80] sm:$0xff]  ;;  %v910_v57 = vld [vmem:[%s1652_s3 + $0x88] sm:$0xff] }
  0x11   : > { %v235_v11 = vld [vmem:[%s1430_s14 + $0x1] sm:$0xff]  ;;  %1202 = vmatpush3.bf16.msra.mxu0 %v1199_v8  ;;  %v236_v27 = vld [vmem:[%s1430_s14 + $0x9] sm:$0xff]  ;;  %1278 = vmatpush3.bf16.msra.mxu1 %v1275_v20  ;;  %v1235_v55 = vpack.c.bf16 %v905_v54, %v904_v53  ;;  %v1239_v58 = vpack.c.bf16 %v910_v57, %v909_v56  ;;  %v912_v60 = vld [vmem:[%s1652_s3 + $0x98] sm:$0xff] }
  0x12   : > { %1045 = vmatprep.mubr.msk.f32.mxu0 %vm246_vm0, %v235_v11  ;;  %1204 = vmatprep.subr.bf16.mxu0 %v1203_v12  ;;  %v225_v31 = vld [vmem:[%s1430_s14] sm:$0xff]  ;;  %v226_v47 = vld [vmem:[%s1430_s14 + $0x8] sm:$0xff]  ;;  %v911_v59 = vld [vmem:[%s1652_s3 + $0x90] sm:$0xff] }
  0x13   : > { %1280 = vmatprep.subr.bf16.mxu1 %v1279_v26  ;;  %v409_v49 = vld [vmem:[%s1430_s14 + $0x2] sm:$0xff]  ;;  %v410_v61 = vld [vmem:[%s1430_s14 + $0xa] sm:$0xff]  ;;  %v1243_v62 = vpack.c.bf16 %v912_v60, %v911_v59  ;;  %v916_v3 = vld [vmem:[%s1652_s3 + $0xb8] sm:$0xff]  ;;  %s224_s14 = scalar_lea.vmem %s1654_s5, %s944_s11 }
  0x14   : > { %v913_v63 = vld [vmem:[%s1652_s3 + $0xa0] sm:$0xff]  ;;  %v914_v0 = vld [vmem:[%s1652_s3 + $0xa8] sm:$0xff]  ;;  %v915_v2 = vld [vmem:[%s1652_s3 + $0xb0] sm:$0xff] }
  0x15   : > { %1206 = vmatpush3.bf16.msra.mxu0 %v1203_v12  ;;  %1282 = vmatpush3.bf16.msra.mxu1 %v1279_v26  ;;  %v1247_v1 = vpack.c.bf16 %v914_v0, %v913_v63  ;;  %v1251_v4 = vpack.c.bf16 %v916_v3, %v915_v2  ;;  %v917_v5 = vld [vmem:[%s1652_s3 + $0xc0] sm:$0xff]  ;;  %v918_v6 = vld [vmem:[%s1652_s3 + $0xc8] sm:$0xff]  ;;  %v919_v8 = vld [vmem:[%s1652_s3 + $0xd0] sm:$0xff] }
  0x16   : > { %1208 = vmatprep.subr.bf16.mxu0 %v1207_v22  ;;  %1284 = vmatprep.subr.bf16.mxu1 %v1283_v34  ;;  %v1255_v7 = vpack.c.bf16 %v918_v6, %v917_v5  ;;  %v920_v9 = vld [vmem:[%s1652_s3 + $0xd8] sm:$0xff]  ;;  %v921_v11 = vld [vmem:[%s1652_s3 + $0xe0] sm:$0xff]  ;;  %v922_v12 = vld [vmem:[%s1652_s3 + $0xe8] sm:$0xff] }
  0x17   : > { %v1259_v10 = vpack.c.bf16 %v920_v9, %v919_v8  ;;  %v1263_v13 = vpack.c.bf16 %v922_v12, %v921_v11  ;;  %v535_v14 = vld [vmem:[%s1652_s3 + $0x50] sm:$0xff]  ;;  %v536_v15 = vld [vmem:[%s1652_s3 + $0x58] sm:$0xff]  ;;  %v537_v20 = vld [vmem:[%s1652_s3 + $0x60] sm:$0xff] }
  0x18   : > { %1046 = vmatmul.mubr.msk.f32.vlgmr.msra.gmra.mrb[0].mxu0 %vm246_vm0, %v236_v27  ;;  %v1291_v16 = vpack.c.bf16 %v536_v15, %v535_v14  ;;  %v923_v17 = vld [vmem:[%s1652_s3 + $0xf0] sm:$0xff]  ;;  %v924_v18 = vld [vmem:[%s1652_s3 + $0xf8] sm:$0xff]  ;;  %v538_v21 = vld [vmem:[%s1652_s3 + $0x68] sm:$0xff] }
  0x19   : > { %1210 = vmatpush3.bf16.msra.mxu0 %v1207_v22  ;;  %1064 = vmatprep.mubr.msk.f32.mxu0 %vm246_vm0, %v225_v31  ;;  %v1267_v19 = vpack.c.bf16 %v924_v18, %v923_v17  ;;  %v1361_v22 = vmov 0.0   ;;  %v1295_v23 = vpack.c.bf16 %v538_v21, %v537_v20  ;;  %v539_v24 = vld [vmem:[%s1652_s3 + $0x70] sm:$0xff]  ;;  %v540_v25 = vld [vmem:[%s1652_s3 + $0x78] sm:$0xff]  ;;  %v925_v27 = vld [vmem:[%s1652_s3 + $0x100] sm:$0xff] }
  0x1a   : > { %1212 = vmatprep.subr.bf16.mxu0 %v1211_v30  ;;  %1286 = vmatpush3.bf16.msra.mxu1 %v1283_v34  ;;  %519 = vst [vmem:[#allocation2 + $0x8] sm:$0xff] %v1361_v22  ;;  %520 = vst [vmem:[#allocation2 + $0x10] sm:$0x3] %v1361_v22  ;;  %v1299_v26 = vpack.c.bf16 %v540_v25, %v539_v24  ;;  %v926_v28 = vld [vmem:[%s1652_s3 + $0x108] sm:$0xff]  ;;  %v927_v39 = vld [vmem:[%s1652_s3 + $0x110] sm:$0xff] }
  0x1b   : > { %1288 = vmatprep.subr.bf16.mxu1 %v1287_v40  ;;  %518 = vst [vmem:[#allocation2] sm:$0xff] %v1361_v22  ;;  %v1303_v29 = vpack.c.bf16 %v926_v28, %v925_v27  ;;  %v930_v45 = vld [vmem:[%s1652_s3 + $0x128] sm:$0xff]  ;;  %v933_v51 = vld [vmem:[%s1652_s3 + $0x140] sm:$0xff]  ;;  %v935_v54 = vld [vmem:[%s1652_s3 + $0x150] sm:$0xff] }
  0x1c   : > { %v937_v57 = vld [vmem:[%s1652_s3 + $0x160] sm:$0xff]  ;;  %v939_v60 = vld [vmem:[%s1652_s3 + $0x170] sm:$0xff] }
  0x1d   : > { %1214 = vmatpush3.bf16.msra.mxu0 %v1211_v30  ;;  %v908_v30 = vld [vmem:[%s1651_s2] ss:$0 sm:$0xff] }
  0x1e   : > { %1216 = vmatprep.subr.bf16.mxu0 %v1215_v37  ;;  %1290 = vmatpush3.bf16.msra.mxu1 %v1287_v40  ;;  %v928_v40 = vld [vmem:[%s1652_s3 + $0x118] sm:$0xff]  ;;  %v941_v3 = vld [vmem:[%s1653_s4] ss:$0 sm:$0xff] }
  0x1f   : > { %1292 = vmatprep.subr.bf16.mxu1 %v1291_v16  ;;  %v1307_v43 = vpack.c.bf16 %v928_v40, %v927_v39 }
  0x21   : > { %1218 = vmatpush3.bf16.msra.mxu0 %v1215_v37 }
  0x22   : > { %1220 = vmatprep.subr.bf16.mxu0 %v1219_v41  ;;  %1294 = vmatpush3.bf16.msra.mxu1 %v1291_v16 }
  0x23   : > { %1296 = vmatprep.subr.bf16.mxu1 %v1295_v23 }
  0x25   : > { %1222 = vmatpush3.bf16.msra.mxu0 %v1219_v41 }
  0x26   : > { %1224 = vmatprep.subr.bf16.mxu0 %v1223_v44  ;;  %1298 = vmatpush3.bf16.msra.mxu1 %v1295_v23 }
  0x27   : > { %1300 = vmatprep.subr.bf16.mxu1 %v1299_v26 }
  0x28   : > { %1065 = vmatmul.mubr.msk.f32.vlgmr.msra.gmra.mrb[0].mxu0 %vm246_vm0, %v226_v47 }
  0x29   : > { %1226 = vmatpush3.bf16.msra.mxu0 %v1223_v44  ;;  %1083 = vmatprep.mubr.msk.f32.mxu0 %vm246_vm0, %v409_v49  ;;  %v929_v44 = vld [vmem:[%s1652_s3 + $0x120] sm:$0xff]  ;;  %v932_v49 = vld [vmem:[%s1652_s3 + $0x138] sm:$0xff] }
  0x2a   : > { %1228 = vmatprep.subr.bf16.mxu0 %v1227_v48  ;;  %1302 = vmatpush3.bf16.msra.mxu1 %v1299_v26  ;;  %v1311_v47 = vpack.c.bf16 %v930_v45, %v929_v44 }
  0x2b   : > { %1304 = vmatprep.subr.bf16.mxu1 %v1303_v29 }
  0x2d   : > { %1230 = vmatpush3.bf16.msra.mxu0 %v1227_v48  ;;  %v931_v48 = vld [vmem:[%s1652_s3 + $0x130] sm:$0xff] }
  0x2e   : > { %1232 = vmatprep.subr.bf16.mxu0 %v1231_v52  ;;  %v1315_v50 = vpack.c.bf16 %v932_v49, %v931_v48 }
  0x31   : > { %1234 = vmatpush3.bf16.msra.mxu0 %v1231_v52  ;;  %v934_v52 = vld [vmem:[%s1652_s3 + $0x148] sm:$0xff] }
  0x32   : > { %1236 = vmatprep.subr.bf16.mxu0 %v1235_v55  ;;  %v1319_v53 = vpack.c.bf16 %v934_v52, %v933_v51 }
  0x35   : > { %1238 = vmatpush3.bf16.msra.mxu0 %v1235_v55  ;;  %v936_v55 = vld [vmem:[%s1652_s3 + $0x158] sm:$0xff] }
  0x36   : > { %1240 = vmatprep.subr.bf16.mxu0 %v1239_v58  ;;  %v1323_v56 = vpack.c.bf16 %v936_v55, %v935_v54 }
  0x38   : > { %1084 = vmatmul.mubr.msk.f32.vlgmr.msra.gmra.mrb[0].mxu0 %vm246_vm0, %v410_v61  ;;  %v940_v61 = vld [vmem:[%s1652_s3 + $0x178] sm:$0xff] }
  0x39   : > { %1242 = vmatpush3.bf16.msra.mxu0 %v1239_v58  ;;  %v938_v58 = vld [vmem:[%s1652_s3 + $0x168] sm:$0xff] }
  0x3a   : > { %1244 = vmatprep.subr.bf16.mxu0 %v1243_v62  ;;  %v1327_v59 = vpack.c.bf16 %v938_v58, %v937_v57 }
  0x3d   : > { %1246 = vmatpush3.bf16.msra.mxu0 %v1243_v62  ;;  %v1331_v62 = vpack.c.bf16 %v940_v61, %v939_v60 }
  0x3e   : > { %1248 = vmatprep.subr.bf16.mxu0 %v1247_v1 }
  0x41   : > { %1250 = vmatpush3.bf16.msra.mxu0 %v1247_v1 }
  0x42   : > { %1252 = vmatprep.subr.bf16.mxu0 %v1251_v4 }
  0x45   : > { %1254 = vmatpush3.bf16.msra.mxu0 %v1251_v4 }
  0x46   : > { %1256 = vmatprep.subr.bf16.mxu0 %v1255_v7 }
  0x49   : > { %1258 = vmatpush3.bf16.msra.mxu0 %v1255_v7 }
  0x4a   : > { %1260 = vmatprep.subr.bf16.mxu0 %v1259_v10 }
  0x4d   : > { %1262 = vmatpush3.bf16.msra.mxu0 %v1259_v10 }
  0x4e   : > { %1264 = vmatprep.subr.bf16.mxu0 %v1263_v13 }
  0x51   : > { %1266 = vmatpush3.bf16.msra.mxu0 %v1263_v13 }
  0x52   : > { %1268 = vmatprep.subr.bf16.mxu0 %v1267_v19 }
  0x55   : > { %1270 = vmatpush3.bf16.msra.mxu0 %v1267_v19 }
 0x10b   : > { %v1085_v31 = vpop.f32.mrb[0].mxu0 }
 0x10c   : > { %v511_v32 = vadd.f32 %v1085_v31, %v908_v30  ;;  %v492_v33 = vpop.f32.mrb[1].mxu0 }
 0x10d   : > { %v510_v34 = vadd.f32 %v908_v30, %v492_v33 }
 0x10e   : > { %vm513_vm1 = vcmp.gt.f32.partialorder %v511_v32, 0.0  ;;  %v515_v35 = vmul.f32 0.2, %v511_v32 }
 0x10f   : > { %vm512_vm2 = vcmp.gt.f32.partialorder %v510_v34, 0.0  ;;  %v514_v36 = vmul.f32 0.2, %v510_v34 }
 0x110   : > { %v517_v37 = vsel %vm513_vm1, %v511_v32, %v515_v35 }
 0x111   : > { %522 = vst [vmem:[#allocation2 + $0x9] sm:$0xff] %v517_v37  ;;  %v516_v38 = vsel %vm512_vm2, %v510_v34, %v514_v36 }
 0x112   : > { %521 = vst [vmem:[#allocation2 + $0x1] sm:$0xff] %v516_v38  ;;  %1118 = vmatprep.mubr.f32.mxu0 %v516_v38 }
 0x113   : > { %1119 = vmatmul.mubr.f32.vlgmr.msra.gmra.mrb[2].mxu0 %v517_v37 }
 0x118   : > { %v711_v63 = vld [vmem:[#allocation2 + $0xa] sm:$0xff] }
 0x119   : > { %v523_v41 = vld [vmem:[#allocation2] sm:$0xff]  ;;  %v524_v42 = vld [vmem:[#allocation2 + $0x8] sm:$0xff] }
 0x11a   : > { %1153 = vmatprep.mubr.f32.mxu1 %v523_v41  ;;  %v710_v46 = vld [vmem:[#allocation2 + $0x2] sm:$0xff] }
 0x11b   : > { %1154 = vmatmul.mubr.f32.vlgmr.msra.gmra.mrb[0].mxu1 %v524_v42 }
 0x11c   : > { %1306 = vmatpush3.bf16.msra.mxu1 %v1303_v29  ;;  %1188 = vmatprep.mubr.f32.mxu1 %v710_v46 }
 0x11d   : > { %1308 = vmatprep.subr.bf16.mxu1 %v1307_v43 }
 0x120   : > { %1310 = vmatpush3.bf16.msra.mxu1 %v1307_v43 }
 0x121   : > { %1312 = vmatprep.subr.bf16.mxu1 %v1311_v47 }
 0x124   : > { %1314 = vmatpush3.bf16.msra.mxu1 %v1311_v47 }
 0x125   : > { %1316 = vmatprep.subr.bf16.mxu1 %v1315_v50 }
 0x128   : > { %1318 = vmatpush3.bf16.msra.mxu1 %v1315_v50 }
 0x129   : > { %1320 = vmatprep.subr.bf16.mxu1 %v1319_v53 }
 0x12c   : > { %1322 = vmatpush3.bf16.msra.mxu1 %v1319_v53 }
 0x12d   : > { %1324 = vmatprep.subr.bf16.mxu1 %v1323_v56 }
 0x130   : > { %1326 = vmatpush3.bf16.msra.mxu1 %v1323_v56 }
 0x131   : > { %1328 = vmatprep.subr.bf16.mxu1 %v1327_v59 }
 0x134   : > { %1330 = vmatpush3.bf16.msra.mxu1 %v1327_v59 }
 0x135   : > { %1332 = vmatprep.subr.bf16.mxu1 %v1331_v62 }
 0x138   : > { %1334 = vmatpush3.bf16.msra.mxu1 %v1331_v62 }
 0x13b   : > { %1189 = vmatmul.mubr.f32.vlgmr.msra.gmra.mrb[0].mxu1 %v711_v63 }
 0x1e6   : > { %v1120_v0 = vpop.f32.mrb[2].mxu0 }
 0x1e7   : > { %v626_v1 = vpop.f32.mrb[3].mxu0 }
 0x20e   : > { %v1190_v2 = vpop.f32.mrb[0].mxu1 }
 0x20f   : > { %v1335_v4 = vadd.f32 %v1190_v2, %v1120_v0  ;;  %v795_v5 = vpop.f32.mrb[1].mxu1 }
 0x210   : > { %v1336_v6 = vadd.f32 %v795_v5, %v626_v1 }
 0x211   : > { %v814_v7 = vadd.f32 %v1335_v4, %v941_v3 }
 0x212   : > { %v813_v8 = vadd.f32 %v1336_v6, %v941_v3 }
 0x213   : > { %vm816_vm3 = vcmp.gt.f32.partialorder %v814_v7, 0.0  ;;  %v818_v9 = vmul.f32 0.2, %v814_v7 }
 0x214   : > { %vm815_vm4 = vcmp.gt.f32.partialorder %v813_v8, 0.0  ;;  %v817_v10 = vmul.f32 0.2, %v813_v8 }
 0x215   : > { %v820_v11 = vsel %vm816_vm3, %v814_v7, %v818_v9 }
 0x216   : > { %822 = vst [vmem:[%s224_s14 + $0x8] sm:$0xff] %v820_v11  ;;  %v819_v12 = vsel %vm815_vm4, %v813_v8, %v817_v10 }
 0x217   : > { %821 = vst [vmem:[%s224_s14] sm:$0xff] %v819_v12 }
 0x218 PF: > { %s15_s18 = sadd.s32 1, %s1359_s18  }
 0x219   : > { %p12_p4 = scmp.ge.s32.totalorder %s15_s18, 4  }
 0x21b   :  { %14 = sbr.rel (!%p12_p4) target bundleno = 1 (0x1), region = 74 }

</bundles_post_ra>
